<compile_context>
chip_gen: v6e
topology: v6e:2x2x1
jax: 0.10.0
libtpu: 0.0.40
codegen_flags: <defaults>
</compile_context>

<pallas_src>
import jax
import jax.numpy as jnp
from jax.experimental import pallas as pl
from jax.experimental.pallas import tpu as pltpu


def _round_up(x, m):
    return (x + m - 1) // m * m


def mlp_kernel(x_ref, w1_ref, b1_ref, w2_ref, b2_ref, w3_ref, b3_ref, o_ref):
    # fc1 + ReLU  (bf16 MXU operands, f32 accumulation, f32 bias/ReLU math)
    x = x_ref[...].astype(jnp.bfloat16)
    h1 = jnp.dot(x, w1_ref[...], preferred_element_type=jnp.float32)
    h1 = jnp.maximum(h1 + b1_ref[...], 0.0)
    # fc2 + ReLU
    h2 = jnp.dot(h1.astype(jnp.bfloat16), w2_ref[...],
                 preferred_element_type=jnp.float32)
    h2 = jnp.maximum(h2 + b2_ref[...], 0.0)
    # fc3 (no activation); output lanes are padded to a multiple of 128 so the
    # store is lane-dense (no masked partial stores).
    h3 = jnp.dot(h2.astype(jnp.bfloat16), w3_ref[...],
                 preferred_element_type=jnp.float32)
    o_ref[...] = (h3 + b3_ref[...]).astype(o_ref.dtype)


def prepare_params(params):
    """One-time parameter re-layout (call once at load time, NOT per forward).

    PyTorch (out, in) weights -> (in, out) bf16; biases -> (1, out) f32;
    classifier dim zero-padded up to a multiple of 128.
    Returns (w1, b1, w2, b2, w3_padded, b3_padded).
    """
    num_classes = params["w3"].shape[0]
    c_pad = _round_up(num_classes, 128)

    w1 = params["w1"].T.astype(jnp.bfloat16)                 # (in, 256)
    w2 = params["w2"].T.astype(jnp.bfloat16)                 # (256, 128)
    w3 = params["w3"].T.astype(jnp.bfloat16)                 # (128, C)
    w3 = jnp.pad(w3, ((0, 0), (0, c_pad - num_classes)))
    b1 = params["b1"].astype(jnp.float32)[None, :]            # (1, 256)
    b2 = params["b2"].astype(jnp.float32)[None, :]            # (1, 128)
    b3 = jnp.pad(params["b3"].astype(jnp.float32),
                 (0, c_pad - num_classes))[None, :]           # (1, Cpad)
    return (w1, b1, w2, b2, w3, b3)


def gait_recognition_forward(x, prepared, num_classes, *, block_m=256):
    """x: (B, input_dim) float32. prepared: output of prepare_params()."""
    w1, b1, w2, b2, w3, b3 = prepared
    b, k = x.shape
    c_pad = w3.shape[1]

    # Row-tile size: up to block_m rows, multiple of 8 (sublane granularity).
    bm = min(block_m, _round_up(b, 8))
    b_pad = _round_up(b, bm)
    if b_pad != b:
        x = jnp.pad(x, ((0, b_pad - b), (0, 0)))

    const = lambda shape: pl.BlockSpec(shape, lambda i: (0,) * len(shape))

    out = pl.pallas_call(
        mlp_kernel,
        out_shape=jax.ShapeDtypeStruct((b_pad, c_pad), jnp.float32),
        grid=(b_pad // bm,),
        in_specs=[
            pl.BlockSpec((bm, k), lambda i: (i, 0)),   # x tiles stream in
            const(w1.shape), const(b1.shape),          # weights/biases resident
            const(w2.shape), const(b2.shape),
            const(w3.shape), const(b3.shape),
        ],
        out_specs=pl.BlockSpec((bm, c_pad), lambda i: (i, 0)),
        compiler_params=pltpu.CompilerParams(
            dimension_semantics=("parallel",)),
    )(x, w1, b1, w2, b2, w3, b3)

    return out[:b, :num_classes]


def init_params(key, input_dim, num_classes):
    """Deterministic synthetic parameters in PyTorch nn.Linear layout."""
    ks = jax.random.split(key, 6)

    def lin(kw, kb, fan_in, fan_out):
        bound = 1.0 / jnp.sqrt(fan_in)
        w = jax.random.uniform(kw, (fan_out, fan_in), jnp.float32, -bound, bound)
        bvec = jax.random.uniform(kb, (fan_out,), jnp.float32, -bound, bound)
        return w, bvec

    w1, b1 = lin(ks[0], ks[1], input_dim, 256)
    w2, b2 = lin(ks[2], ks[3], 256, 128)
    w3, b3 = lin(ks[4], ks[5], 128, num_classes)
    return {"w1": w1, "b1": b1, "w2": w2, "b2": b2, "w3": w3, "b3": b3}


def reference_forward(x, p):
    h = jnp.maximum(x @ p["w1"].T + p["b1"], 0.0)
    h = jnp.maximum(h @ p["w2"].T + p["b2"], 0.0)
    return h @ p["w3"].T + p["b3"]


if __name__ == "__main__":
    key = jax.random.PRNGKey(0)
    k_x, k_p = jax.random.split(key)

    batch, input_dim, num_classes = 8, 64, 16
    x = jax.random.normal(k_x, (batch, input_dim), jnp.float32)
    params = init_params(k_p, input_dim, num_classes)

    # One-time weight re-layout (transpose + bf16 + classifier padding).
    prepared = jax.tree.map(jax.block_until_ready, prepare_params(params))

    out = gait_recognition_forward(x, prepared, num_classes)
    out = jax.block_until_ready(out)

    ref = reference_forward(x, params)   # full f32 reference
    assert out.shape == (batch, num_classes)
    # bf16 weights/activations in the kernel -> loose tolerance vs f32 ref.
    assert jnp.allclose(out, ref, atol=1e-1, rtol=5e-2), float(
        jnp.max(jnp.abs(out - ref)))

    print("KERNEL_OK")
</pallas_src>

<mosaic_0001>
module attributes {stable_mosaic.version = 11 : i64} {
  func.func @mlp_kernel(%arg0: i32, %arg1: memref<8x64xf32, #tpu.memory_space<vmem>>, %arg2: memref<64x256xbf16, #tpu.memory_space<vmem>>, %arg3: memref<1x256xf32, #tpu.memory_space<vmem>>, %arg4: memref<256x128xbf16, #tpu.memory_space<vmem>>, %arg5: memref<1x128xf32, #tpu.memory_space<vmem>>, %arg6: memref<128x128xbf16, #tpu.memory_space<vmem>>, %arg7: memref<1x128xf32, #tpu.memory_space<vmem>>, %arg8: memref<8x128xf32, #tpu.memory_space<vmem>>) attributes {dimension_semantics = [#tpu.dimension_semantics<parallel>], iteration_bounds = array<i64: 1>, scalar_prefetch = 0 : i64, scratch_operands = 0 : i64, tpu.core_type = #tpu.core_type<tc>, window_params = [{transform_indices = @transform_0, window_bounds = array<i64: 8, 64>}, {pipeline_mode = #tpu.pipeline_mode<synchronous>, transform_indices = @transform_1, window_bounds = array<i64: 64, 256>}, {pipeline_mode = #tpu.pipeline_mode<synchronous>, transform_indices = @transform_2, window_bounds = array<i64: 1, 256>}, {pipeline_mode = #tpu.pipeline_mode<synchronous>, transform_indices = @transform_3, window_bounds = array<i64: 256, 128>}, {pipeline_mode = #tpu.pipeline_mode<synchronous>, transform_indices = @transform_4, window_bounds = array<i64: 1, 128>}, {pipeline_mode = #tpu.pipeline_mode<synchronous>, transform_indices = @transform_5, window_bounds = array<i64: 128, 128>}, {pipeline_mode = #tpu.pipeline_mode<synchronous>, transform_indices = @transform_6, window_bounds = array<i64: 1, 128>}, {transform_indices = @transform_7, window_bounds = array<i64: 8, 128>}]} {
    %c0 = arith.constant 0 : index
    %c0_0 = arith.constant 0 : index
    %0 = vector.load %arg1[%c0, %c0_0] : memref<8x64xf32, #tpu.memory_space<vmem>>, vector<8x64xf32>
    %1 = arith.truncf %0 : vector<8x64xf32> to vector<8x64xbf16>
    %c0_1 = arith.constant 0 : index
    %c0_2 = arith.constant 0 : index
    %2 = vector.load %arg2[%c0_1, %c0_2] : memref<64x256xbf16, #tpu.memory_space<vmem>>, vector<64x256xbf16>
    %cst = arith.constant dense<0.000000e+00> : vector<8x256xf32>
    %3 = tpu.matmul %1, %2, %cst {dimension_numbers = #tpu.dot_dimension_numbers<[1], [0], [0], [1], [0, 0, 1, 1], [], []>} : vector<8x64xbf16>, vector<64x256xbf16>, vector<8x256xf32> -> vector<8x256xf32>
    %c0_3 = arith.constant 0 : index
    %c0_4 = arith.constant 0 : index
    %4 = vector.load %arg3[%c0_3, %c0_4] : memref<1x256xf32, #tpu.memory_space<vmem>>, vector<1x256xf32>
    %5 = vector.broadcast %4 : vector<1x256xf32> to vector<8x256xf32>
    %6 = arith.addf %3, %5 : vector<8x256xf32>
    %cst_5 = arith.constant 0.000000e+00 : f32
    %7 = vector.broadcast %cst_5 : f32 to vector<8x256xf32>
    %8 = arith.maximumf %6, %7 : vector<8x256xf32>
    %9 = arith.truncf %8 : vector<8x256xf32> to vector<8x256xbf16>
    %c0_6 = arith.constant 0 : index
    %c0_7 = arith.constant 0 : index
    %10 = vector.load %arg4[%c0_6, %c0_7] : memref<256x128xbf16, #tpu.memory_space<vmem>>, vector<256x128xbf16>
    %cst_8 = arith.constant dense<0.000000e+00> : vector<8x128xf32>
    %11 = tpu.matmul %9, %10, %cst_8 {dimension_numbers = #tpu.dot_dimension_numbers<[1], [0], [0], [1], [0, 0, 1, 1], [], []>} : vector<8x256xbf16>, vector<256x128xbf16>, vector<8x128xf32> -> vector<8x128xf32>
    %c0_9 = arith.constant 0 : index
    %c0_10 = arith.constant 0 : index
    %12 = vector.load %arg5[%c0_9, %c0_10] : memref<1x128xf32, #tpu.memory_space<vmem>>, vector<1x128xf32>
    %13 = vector.broadcast %12 : vector<1x128xf32> to vector<8x128xf32>
    %14 = arith.addf %11, %13 : vector<8x128xf32>
    %cst_11 = arith.constant 0.000000e+00 : f32
    %15 = vector.broadcast %cst_11 : f32 to vector<8x128xf32>
    %16 = arith.maximumf %14, %15 : vector<8x128xf32>
    %17 = arith.truncf %16 : vector<8x128xf32> to vector<8x128xbf16>
    %c0_12 = arith.constant 0 : index
    %c0_13 = arith.constant 0 : index
    %18 = vector.load %arg6[%c0_12, %c0_13] : memref<128x128xbf16, #tpu.memory_space<vmem>>, vector<128x128xbf16>
    %cst_14 = arith.constant dense<0.000000e+00> : vector<8x128xf32>
    %19 = tpu.matmul %17, %18, %cst_14 {dimension_numbers = #tpu.dot_dimension_numbers<[1], [0], [0], [1], [0, 0, 1, 1], [], []>} : vector<8x128xbf16>, vector<128x128xbf16>, vector<8x128xf32> -> vector<8x128xf32>
    %c0_15 = arith.constant 0 : index
    %c0_16 = arith.constant 0 : index
    %20 = vector.load %arg7[%c0_15, %c0_16] : memref<1x128xf32, #tpu.memory_space<vmem>>, vector<1x128xf32>
    %21 = vector.broadcast %20 : vector<1x128xf32> to vector<8x128xf32>
    %22 = arith.addf %19, %21 : vector<8x128xf32>
    %c0_17 = arith.constant 0 : index
    %c0_18 = arith.constant 0 : index
    %23 = vector.load %arg8[%c0_17, %c0_18] : memref<8x128xf32, #tpu.memory_space<vmem>>, vector<8x128xf32>
    tpu.vector_store %arg8[%c0_17, %c0_18], %22 {strides = array<i32>} : memref<8x128xf32, #tpu.memory_space<vmem>>, vector<8x128xf32>,
    return
  }
  func.func @transform_0(%arg0: i32) -> (i32, i32) {
    %c0_i32 = arith.constant 0 : i32
    %c0_i32_0 = arith.constant 0 : i32
    return %arg0, %c0_i32 : i32, i32
  }
  func.func @transform_1(%arg0: i32) -> (i32, i32) {
    %c0_i32 = arith.constant 0 : i32
    %c0_i32_0 = arith.constant 0 : i32
    %c0_i32_1 = arith.constant 0 : i32
    return %c0_i32, %c0_i32_0 : i32, i32
  }
  func.func @transform_2(%arg0: i32) -> (i32, i32) {
    %c0_i32 = arith.constant 0 : i32
    %c0_i32_0 = arith.constant 0 : i32
    %c0_i32_1 = arith.constant 0 : i32
    return %c0_i32, %c0_i32_0 : i32, i32
  }
  func.func @transform_3(%arg0: i32) -> (i32, i32) {
    %c0_i32 = arith.constant 0 : i32
    %c0_i32_0 = arith.constant 0 : i32
    %c0_i32_1 = arith.constant 0 : i32
    return %c0_i32, %c0_i32_0 : i32, i32
  }
  func.func @transform_4(%arg0: i32) -> (i32, i32) {
    %c0_i32 = arith.constant 0 : i32
    %c0_i32_0 = arith.constant 0 : i32
    %c0_i32_1 = arith.constant 0 : i32
    return %c0_i32, %c0_i32_0 : i32, i32
  }
  func.func @transform_5(%arg0: i32) -> (i32, i32) {
    %c0_i32 = arith.constant 0 : i32
    %c0_i32_0 = arith.constant 0 : i32
    %c0_i32_1 = arith.constant 0 : i32
    return %c0_i32, %c0_i32_0 : i32, i32
  }
  func.func @transform_6(%arg0: i32) -> (i32, i32) {
    %c0_i32 = arith.constant 0 : i32
    %c0_i32_0 = arith.constant 0 : i32
    %c0_i32_1 = arith.constant 0 : i32
    return %c0_i32, %c0_i32_0 : i32, i32
  }
  func.func @transform_7(%arg0: i32) -> (i32, i32) {
    %c0_i32 = arith.constant 0 : i32
    %c0_i32_0 = arith.constant 0 : i32
    return %arg0, %c0_i32 : i32, i32
  }
}

</mosaic_0001>

<bundles_post_ra>
// kernel: tpu_custom_call.1
= control target key start
LH: loop header
LB: loop body
LE: loop exit
PB: predicated region body
PF: predicated region fallthrough
CT: control target
= control target key end

     0   :  { %12 = vsyncpa [#allocation3], 0  ;;  %s816_s0 = inlined_call_operand.hbm [shape: f32[8,64], index: 0, kind: input, shape index: {}]   ;;  %s817_s1 = inlined_call_operand.hbm [shape: bf16[64,256], index: 1, kind: input, shape index: {}]   ;;  %s818_s2 = inlined_call_operand.vmem [shape: f32[1,256], index: 2, kind: input, shape index: {}]   ;;  %s819_s3 = inlined_call_operand.hbm [shape: bf16[256,128], index: 3, kind: input, shape index: {}]   ;;  %s820_s4 = inlined_call_operand.vmem [shape: f32[1,128], index: 4, kind: input, shape index: {}]   ;;  %s821_s5 = inlined_call_operand.hbm [shape: bf16[128,128], index: 5, kind: input, shape index: {}]   ;;  %s822_s6 = inlined_call_operand.vmem [shape: f32[1,128], index: 6, kind: input, shape index: {}]   ;;  %s823_s7 = inlined_call_operand.hbm [shape: f32[8,128], index: 7, kind: output, shape index: {}]  }
   0x1   :  { %13 = vsyncpa [#allocation6], 0 }
   0x2   :  { %14 = vsyncpa [#allocation9], 0 }
   0x3   :  { %15 = vsyncpa [#allocation4], 0  ;;  %s740_s24 = smov [#allocation5]  }
   0x4   :  { %s31_s25 = sshll.u32 %s740_s24, 4  ;;  %s32_s25 = int_to_ptr.vmem [resolvable:$true] %s31_s25 }
   0x5   :  { %s640_s26 = scalar_lea.vmem %s32_s25, 1024  ;;  %p645_p1 = scmp.lt.s32.totalorder %s32_s25, %s32_s25 }
   0x6   :  { %p641_p0 = scmp.ne.s32.totalorder %s32_s25, %s640_s26  ;;  %p646_p2 = scmp.lt.s32.totalorder %s640_s26, %s640_s26 }
   0x8   :  { %p647_p3 = por %p646_p2, %p645_p1 }
   0xa   :  { %p648_p4 = pnand %p647_p3, %p641_p0 }
   0xc   :  { %651 = shalt.err (!%p648_p4)
}
   0xd   :  { %s741_s27 = smov 128   ;;  %s742_s28 = smov 8  }
   0xe   :  { %37 = dma.hbm_to_vmem [thread:$0]  %s817_s1, 1024, %s32_s25, [#allocation6], %s741_s27, %s741_s27, %s742_s28  }
   0xf   :  { %s743_s8 = smov [#allocation2]   ;;  %s744_s10 = smov [#allocation7]  }
  0x10   :  { %s22_s9 = sshll.u32 %s743_s8, 4  ;;  %s45_s11 = sshll.u32 %s744_s10, 4  ;;  %s23_s9 = int_to_ptr.vmem [resolvable:$true] %s22_s9  ;;  %s46_s11 = int_to_ptr.vmem [resolvable:$true] %s45_s11 }
  0x11   :  { %s660_s12 = scalar_lea.vmem %s23_s9, 128  ;;  %p665_p6 = scmp.lt.s32.totalorder %s23_s9, %s23_s9 }
  0x12   :  { %p661_p5 = scmp.ne.s32.totalorder %s23_s9, %s660_s12  ;;  %p666_p7 = scmp.lt.s32.totalorder %s660_s12, %s660_s12 }
  0x14   :  { %p667_p8 = por %p666_p7, %p665_p6 }
  0x16   :  { %p668_p9 = pnand %p667_p8, %p661_p5 }
  0x18   :  { %671 = shalt.err (!%p668_p9)
}
  0x19   :  { %25 = dma.hbm_to_vmem [thread:$0]  %s816_s0, 128, %s23_s9, [#allocation3]  }
  0x1a   :  { %s680_s15 = scalar_lea.vmem %s46_s11, 2048  ;;  %p685_p11 = scmp.lt.s32.totalorder %s46_s11, %s46_s11 }
  0x1b   :  { %p681_p10 = scmp.ne.s32.totalorder %s46_s11, %s680_s15  ;;  %p686_p12 = scmp.lt.s32.totalorder %s680_s15, %s680_s15 }
  0x1d   :  { %p687_p13 = por %p686_p12, %p685_p11 }
  0x1f   :  { %p688_p0 = pnand %p687_p13, %p681_p10 }
  0x21   :  { %691 = shalt.err (!%p688_p0)
}
  0x22   :  { %s745_s1 = smov 64   ;;  %s746_s16 = smov 4  }
  0x23   :  { %51 = dma.hbm_to_vmem [thread:$0]  %s819_s3, 2048, %s46_s11, [#allocation6], %s745_s1, %s745_s1, %s746_s16  }
  0x24   :  { %s747_s19 = smov [#allocation8]  }
  0x25   :  { %s59_s20 = sshll.u32 %s747_s19, 4  ;;  %s60_s20 = int_to_ptr.vmem [resolvable:$true] %s59_s20 }
  0x26   :  { %s700_s21 = scalar_lea.vmem %s60_s20, 1024  ;;  %p705_p2 = scmp.lt.s32.totalorder %s60_s20, %s60_s20 }
  0x27   :  { %p701_p1 = scmp.ne.s32.totalorder %s60_s20, %s700_s21  ;;  %p706_p3 = scmp.lt.s32.totalorder %s700_s21, %s700_s21 }
  0x29   :  { %p707_p4 = por %p706_p3, %p705_p2 }
  0x2b   :  { %p708_p5 = pnand %p707_p4, %p701_p1 }
  0x2d   :  { %711 = shalt.err (!%p708_p5)
}
  0x2e   :  { %65 = dma.hbm_to_vmem [thread:$0]  %s821_s5, 1024, %s60_s20, [#allocation9], %s745_s1, %s745_s1, %s746_s16  }
  0x2f   :  { %732 = dma.done.wait [#allocation3], 128  }
  0x30   :  { %733 = vsyncadd [#allocation3], 4294967168 }
  0x31   :  { %734 = dma.done.wait [#allocation6], 3072  }
  0x32   :  { %735 = vsyncadd [#allocation6], 4294964224 }
  0x33   :  { %736 = dma.done.wait [#allocation9], 1024  }
  0x34   :  { %737 = vsyncadd [#allocation9], 4294966272  ;;  %v748_v0 = vmov 0   ;;  %v596_v1 = vld [vmem:[#allocation5 + $0x34] ss:$8 sps:$4 sm:$0xff]   ;;  %v612_v13 = vld [vmem:[#allocation7 + $0x68] sm:$0xff]   ;;  %v93_v33 = vlaneseq }
  0x35   :  { %179 = vmatprep.mubr.bf16.mxu0 %v748_v0  ;;  %v598_v2 = vld [vmem:[#allocation5 + $0x30] ss:$8 sps:$4 sm:$0xff]   ;;  %155 = vmatprep.subr.bf16.mxu0 %v596_v1  ;;  %v599_v3 = vld [vmem:[#allocation5 + $0x24] ss:$8 sps:$4 sm:$0xff]   ;;  %v601_v4 = vld [vmem:[#allocation5 + $0x20] ss:$8 sps:$4 sm:$0xff]  }
  0x36   :  { %156 = vmatpush1.bf16.msra.mxu0 %v598_v2  ;;  %v602_v5 = vld [vmem:[#allocation5 + $0x14] ss:$8 sps:$4 sm:$0xff]   ;;  %v604_v6 = vld [vmem:[#allocation5 + $0x10] ss:$8 sps:$4 sm:$0xff]   ;;  %v605_v7 = vld [vmem:[#allocation5 + $0x4] ss:$8 sps:$4 sm:$0xff]  }
  0x37   :  { %157 = vmatprep.subr.bf16.mxu0 %v599_v3  ;;  %v608_v8 = vld [vmem:[#allocation7 + $0x78] sm:$0xff]   ;;  %v610_v10 = vld [vmem:[#allocation7 + $0x70] sm:$0xff]   ;;  %v607_v11 = vld [vmem:[#allocation5] ss:$8 sps:$4 sm:$0xff]   ;;  %vm143_vm0 = vcmask 523264   ;;  %v749_v28 = vmov 0.0  }
  0x38   :  { %v609_v9 = vld [vmem:[#allocation7 + $0x38] sm:$0xff]   ;;  %533 = vmatprep.subr.bf16.mxu1 %v608_v8  ;;  %v611_v12 = vld [vmem:[#allocation7 + $0x30] sm:$0xff]   ;;  %v613_v15 = vld [vmem:[#allocation7 + $0x28] sm:$0xff]   ;;  %v94_v34 = vshrl.u32 %v93_v33, 7  ;;  %vm750_vm1 = vmmov 0   ;;  %s751_s26 = smov [#allocation10]  }
  0x39   :  { %534 = vmatpush3.bf16.msra.mxu1 %v609_v9  ;;  %v81_v14 = vld [vmem:[#allocation2] sm:$0xff]  ;;  %v614_v17 = vld [vmem:[#allocation7 + $0x60] sm:$0xff]   ;;  %v618_v21 = vld [vmem:[#allocation7 + $0x50] sm:$0xff]   ;;  %s487_s27 = sshll.u32 %s751_s26, 4  ;;  %s488_s27 = int_to_ptr.vmem [resolvable:$true] %s487_s27 }
  0x3a   :  { %158 = vmatpush1.bf16.msra.mxu0 %v601_v4  ;;  %535 = vmatprep.subr.bf16.mxu1 %v610_v10  ;;  %v82_v16 = vpack.c.bf16 %v81_v14, %v81_v14  ;;  %v615_v18 = vld [vmem:[#allocation7 + $0x20] sm:$0xff]   ;;  %v616_v19 = vld [vmem:[#allocation7 + $0x58] sm:$0xff]   ;;  %v619_v22 = vld [vmem:[#allocation7 + $0x10] sm:$0xff]   ;;  %v95_v35 = vsub.s32 0, %v94_v34  ;;  %v99_v37 = vsub.s32 1, %v94_v34  ;;  %p717_p7 = scmp.lt.s32.totalorder %s488_s27, %s488_s27 }
  0x3b   :  { %159 = vmatprep.subr.bf16.mxu0 %v602_v5  ;;  %v617_v20 = vld [vmem:[#allocation7 + $0x18] sm:$0xff]   ;;  %v620_v23 = vld [vmem:[#allocation7 + $0x48] sm:$0xff]   ;;  %v622_v25 = vld [vmem:[#allocation7 + $0x40] sm:$0xff]  }
  0x3c   :  { %v621_v24 = vld [vmem:[#allocation7 + $0x8] sm:$0xff]   ;;  %v623_v26 = vld [vmem:[#allocation7] sm:$0xff]   ;;  %v624_v27 = vld [vmem:[#allocation8 + $0x38] sm:$0xff]  }
  0x3d   :  { %536 = vmatpush3.bf16.msra.mxu1 %v611_v12  ;;  %v625_v29 = vld [vmem:[#allocation8 + $0x30] sm:$0xff]   ;;  %v626_v30 = vld [vmem:[#allocation8 + $0x28] sm:$0xff]   ;;  %v627_v31 = vld [vmem:[#allocation8 + $0x20] sm:$0xff]  }
  0x3e   :  { %160 = vmatpush1.bf16.msra.mxu0 %v604_v6  ;;  %537 = vmatprep.subr.bf16.mxu1 %v612_v13  ;;  %v628_v32 = vld [vmem:[#allocation8 + $0x18] sm:$0xff]   ;;  %v629_v50 = vld [vmem:[#allocation8 + $0x10] sm:$0xff]   ;;  %v630_v51 = vld [vmem:[#allocation8 + $0x8] sm:$0xff]  }
  0x3f   :  { %161 = vmatprep.subr.bf16.mxu0 %v605_v7  ;;  %v91_v36 = vld [vmem:[%s818_s2] sm:$0x3]  ;;  %v631_v52 = vld [vmem:[#allocation8] sm:$0xff]  }
  0x40   :  { %v96_v38 = vrot.slane %v91_v36, %v95_v35  ;;  %v100_v39 = vrot.slane %v91_v36, %v99_v37  ;;  %v507_v54 = vld [vmem:[%s820_s4] ss:$0 sm:$0xff]  ;;  %s712_s4 = scalar_lea.vmem %s488_s27, 128 }
  0x41   :  { %538 = vmatpush3.bf16.msra.mxu1 %v613_v15  ;;  %v524_v62 = vld [vmem:[%s822_s6] ss:$0 sm:$0xff]  ;;  %p713_p6 = scmp.ne.s32.totalorder %s488_s27, %s712_s4  ;;  %p718_p8 = scmp.lt.s32.totalorder %s712_s4, %s712_s4 }
  0x42   :  { %162 = vmatpush1.bf16.msra.mxu0 %v607_v11  ;;  %539 = vmatprep.subr.bf16.mxu1 %v614_v17 }
  0x43   :  { %564 = vmatprep.subr.bf16.mxu0 %v749_v28  ;;  %p719_p9 = por %p718_p8, %p717_p7 }
  0x45   :  { %506 = vmatmul.mubr.msk.bf16.vlgmr.msra.gmra.mxu0 %vm143_vm0, %v82_v16  ;;  %540 = vmatpush3.bf16.msra.mxu1 %v615_v18  ;;  %p720_p10 = pnand %p719_p9, %p713_p6 }
  0x46   :  { %541 = vmatprep.subr.bf16.mxu1 %v616_v19  ;;  %565 = vmatpush3.bf16.msra.mxu0 %v624_v27 }
  0x47   :  { %566 = vmatprep.subr.bf16.mxu0 %v749_v28  ;;  %580 = vmatprep.mubr.msk.bf16.mxu0 %vm750_vm1, %v749_v28 }
  0x49   :  { %542 = vmatpush3.bf16.msra.mxu1 %v617_v20 }
  0x4a   :  { %543 = vmatprep.subr.bf16.mxu1 %v618_v21  ;;  %567 = vmatpush3.bf16.msra.mxu0 %v625_v29 }
  0x4b   :  { %568 = vmatprep.subr.bf16.mxu0 %v749_v28 }
  0x4d   :  { %544 = vmatpush3.bf16.msra.mxu1 %v619_v22 }
  0x4e   :  { %545 = vmatprep.subr.bf16.mxu1 %v620_v23  ;;  %569 = vmatpush3.bf16.msra.mxu0 %v626_v30 }
  0x4f   :  { %570 = vmatprep.subr.bf16.mxu0 %v749_v28 }
  0x51   :  { %546 = vmatpush3.bf16.msra.mxu1 %v621_v24 }
  0x52   :  { %547 = vmatprep.subr.bf16.mxu1 %v622_v25  ;;  %571 = vmatpush3.bf16.msra.mxu0 %v627_v31 }
  0x53   :  { %572 = vmatprep.subr.bf16.mxu0 %v749_v28 }
  0x55   :  { %548 = vmatpush3.bf16.msra.mxu1 %v623_v26 }
  0x56   :  { %573 = vmatpush3.bf16.msra.mxu0 %v628_v32 }
  0x57   :  { %574 = vmatprep.subr.bf16.mxu0 %v749_v28 }
  0x5a   :  { %575 = vmatpush3.bf16.msra.mxu0 %v629_v50 }
  0x5b   :  { %576 = vmatprep.subr.bf16.mxu0 %v749_v28 }
  0x5e   :  { %577 = vmatpush3.bf16.msra.mxu0 %v630_v51 }
  0x5f   :  { %578 = vmatprep.subr.bf16.mxu0 %v749_v28 }
  0x62   :  { %579 = vmatpush3.bf16.msra.mxu0 %v631_v52 }
 0x105   :  { %v181_v40 = vpop.f32.mrf.mxu0 }
 0x106   :  { %v182_v41 = vadd.f32 %v181_v40, %v96_v38 }
 0x107   :  { %v183_v42 = vpop.f32.mrf.mxu0 }
 0x108   :  { %v184_v43 = vadd.f32 %v183_v42, %v100_v39  ;;  %v188_v44 = vmax.f32 %v182_v41, 0.0 }
 0x109   :  { %v185_v45 = vpop.f32.mrf.mxu0 }
 0x10a   :  { %v189_v46 = vmax.f32 %v184_v43, 0.0  ;;  %v190_v49 = vpack.c.bf16 %v188_v44, %v188_v44 }
 0x10b   :  { %v186_v47 = vpop.f32.mrf.mxu0 }
 0x10c   :  { %v191_v48 = vpack.c.bf16 %v189_v46, %v189_v46 }
 0x10e   :  { %359 = vmatprep.mubr.bf16.mxu1 %v191_v48 }
 0x10f   :  { %360 = vmatmul.mubr.bf16.vlgmr.msra.gmra.mxu1 %v190_v49 }
 0x1cf   :  { %v549_v53 = vpop.f32.mrf.mxu1 }
 0x1d1   :  { %v550_v55 = vpop.f32.mrf.mxu1 }
 0x1d2   :  { %v551_v56 = vadd.f32 %v550_v55, %v549_v53 }
 0x1d3   :  { %v552_v57 = vpop.f32.mrf.mxu1 }
 0x1d4   :  { %v362_v58 = vadd.f32 %v551_v56, %v507_v54 }
 0x1d5   :  { %v553_v59 = vpop.f32.mrf.mxu1 }
 0x1d6   :  { %v367_v60 = vmax.f32 %v362_v58, 0.0 }
 0x1d8   :  { %v368_v61 = vpack.c.bf16 %v367_v60, %v367_v60 }
 0x1da   :  { %581 = vmatmul.mubr.bf16.vlgmr.msra.gmra.mxu0 %v368_v61 }
 0x29a   :  { %v474_v63 = vpop.f32.mrf.mxu0 }
 0x29b   :  { %v475_v0 = vadd.f32 %v524_v62, %v474_v63 }
 0x29c   :  { %v582_v1 = vpop.f32.mrf.mxu0 }
 0x29d   :  { %480 = vst [vmem:[#allocation10] sm:$0xff] %v475_v0 }
 0x29e   :  { %v477_v2 = vpop.f32.mrf.mxu0 }
 0x29f   :  { %723 = shalt.err (!%p720_p10)
}
 0x2a0   :  { %490 = dma.vmem_to_hbm [thread:$0]  %s488_s27, 128, %s823_s7, [#allocation4]   ;;  %v583_v3 = vpop.f32.mrf.mxu0 }
 0x2a1   :  { %738 = dma.done.wait [#allocation4], 128  }
 0x2a2   :  { %739 = vsyncadd [#allocation4], 4294967168 }
 0x2a3   :  { %494 = vsyncpa [#allocation3], 1 }
 0x2a4   :  { %495 = vsyncpa [#allocation6], 1 }
 0x2a5   :  { %496 = vsyncpa [#allocation9], 1 }
 0x2a6   :  { %497 = vsyncpa [#allocation4], 1 }

</bundles_post_ra>
